<compile_context>
chip_gen: v7x
topology: tpu7x:2x2x1
jax: 0.10.0
libtpu: 0.0.40
codegen_flags: <defaults>
</compile_context>

<pallas_src>
import math

import jax
import jax.numpy as jnp
from jax import lax
from jax.experimental import pallas as pl
from jax.experimental.pallas import tpu as pltpu


def sign(x):
    if x > 0:
        return 1
    elif x < 0:
        return -1
    else:
        return 0


def _round_up(x, m):
    return ((x + m - 1) // m) * m


# ----------------------------------------------------------------------------
# Pallas kernel: one dense GEMM per M-tile.
#   out[:, tile] = W (Cout, Kc) @ P[:, tile] (Kc, TM)
# Lane dim of the output is TM (>=128, 128-aligned) -> unmasked vector stores.
# ----------------------------------------------------------------------------
def _gemm_kernel(w_ref, p_ref, o_ref):
    o_ref[...] = jnp.dot(
        w_ref[...], p_ref[...],
        preferred_element_type=jnp.float32).astype(o_ref.dtype)


def _dilated_strided_conv2d_pallas(x_pad, weight, stride, dilation):
    """conv2d(x_pad, weight, stride=stride, dilation=dilation, padding=0, bias=None).

    x_pad : (B, Cin, Hp, Wp)  NCHW
    weight: (Cout, Cin, K, K) OIHW
    returns (B, Cout, Ho, Wo)
    """
    B, Cin, Hp, Wp = x_pad.shape
    Cout, _, K, _ = weight.shape
    eff = dilation * (K - 1) + 1
    Ho = (Hp - eff) // stride + 1
    Wo = (Wp - eff) // stride + 1
    M = B * Ho * Wo
    T = K * K
    Kc = T * Cin  # folded contraction dim (taps x input channels)

    # --- glue: im2col, built directly in the lane-friendly (Kc, M) layout ---
    # row index = (ky*K + kx) * Cin + cin ; column index = b*Ho*Wo + h*Wo + w
    taps = []
    for ky in range(K):
        for kx in range(K):
            h0 = ky * dilation
            w0 = kx * dilation
            sl = lax.slice(
                x_pad,
                (0, 0, h0, w0),
                (B, Cin, h0 + (Ho - 1) * stride + 1, w0 + (Wo - 1) * stride + 1),
                (1, 1, stride, stride),
            )  # (B, Cin, Ho, Wo)
            taps.append(jnp.transpose(sl, (1, 0, 2, 3)).reshape(Cin, M))
    patches = jnp.concatenate(taps, axis=0)  # (Kc, M)

    # weight folded to (Cout, Kc) with matching (ky, kx, cin) ordering
    wmat = jnp.transpose(weight, (0, 2, 3, 1)).reshape(Cout, Kc)

    # --- pad to TPU-friendly shapes (zeros are exact for the GEMM) ---
    Kc_pad = _round_up(Kc, 8)
    Cout_pad = _round_up(Cout, 8)
    if M <= 512:
        TM = _round_up(M, 128)
        M_pad = TM
    else:
        TM = 512
        M_pad = _round_up(M, TM)

    if Kc_pad != Kc or M_pad != M:
        patches = jnp.pad(patches, ((0, Kc_pad - Kc), (0, M_pad - M)))
    if Cout_pad != Cout or Kc_pad != Kc:
        wmat = jnp.pad(wmat, ((0, Cout_pad - Cout), (0, Kc_pad - Kc)))

    # Per-tile working set (f32, double-buffered patches/out + resident weight)
    # is a few hundred KiB at TM=512 -> comfortably inside every generation's
    # default scoped VMEM limit, so no vmem_limit override is needed.
    out_mat = pl.pallas_call(
        _gemm_kernel,
        out_shape=jax.ShapeDtypeStruct((Cout_pad, M_pad), jnp.float32),
        grid_spec=pltpu.PrefetchScalarGridSpec(
            num_scalar_prefetch=0,
            grid=(M_pad // TM,),
            in_specs=[
                pl.BlockSpec((Cout_pad, Kc_pad), lambda i: (0, 0)),  # whole weight
                pl.BlockSpec((Kc_pad, TM), lambda i: (0, i)),        # M-tile
            ],
            out_specs=pl.BlockSpec((Cout_pad, TM), lambda i: (0, i)),
        ),
        compiler_params=pltpu.CompilerParams(
            dimension_semantics=("parallel",)),
    )(wmat, patches)

    out = out_mat[:Cout, :M].reshape(Cout, B, Ho, Wo)
    return jnp.transpose(out, (1, 0, 2, 3))  # back to NCHW


def _reflect_pad_nchw(x, pad):
    """pad = (left, right, top, bottom) as in torch.nn.functional.pad for 4D."""
    left, right, top, bottom = pad
    return jnp.pad(x, ((0, 0), (0, 0), (top, bottom), (left, right)),
                   mode='reflect')


class CasualSubcostLayerPallas:
    """JAX/Pallas port of Casual_Subcost_layer."""

    def __init__(self, channel_in, channel_out, angRes, key):
        self.angRes = angRes
        k0 = angRes // 2 + 1
        k1 = angRes // 4 + 1
        k2 = angRes // 8 + 1
        keys = jax.random.split(key, 3)

        def init(k, ksize):
            fan_in = channel_in * ksize * ksize
            bound = 1.0 / math.sqrt(fan_in)  # PyTorch Conv2d default init scale
            return jax.random.uniform(
                k, (channel_out, channel_in, ksize, ksize),
                dtype=jnp.float32, minval=-bound, maxval=bound)

        self.w0 = init(keys[0], k0)  # DSAFE_0.weight
        self.w1 = init(keys[1], k1)  # DSAFE_1.weight
        self.w2 = init(keys[2], k2)  # DSAFE_2.weight

    def __call__(self, x, interval, index, mindisp, case):
        angRes = self.angRes
        d = mindisp + index * interval

        if d == 0:
            dilat = 1
            P = int(angRes // 2 * dilat)
            weight = self.w0
        elif index % 4 == 0:
            dilat = int(sign(d) * (d * angRes - 1))
            P = int(angRes // 2 * dilat)
            weight = self.w0
        elif index % 4 == 2:
            dilat = int(sign(d) * 2 * (d * angRes - 1))
            P = int(angRes // 4 * dilat)
            weight = self.w1
        else:
            dilat = int(sign(d) * 4 * (d * angRes - 1))
            P = int(angRes // 8 * dilat)
            weight = self.w2

        if case == 1:
            pad = (P, 0, P, 0)
        elif case == 2:
            pad = (0, P, P, 0)
        elif case == 3:
            pad = (P, 0, 0, P)
        else:
            pad = (0, P, 0, P)

        x_pad = _reflect_pad_nchw(x, pad)
        cost = _dilated_strided_conv2d_pallas(x_pad, weight,
                                              stride=angRes, dilation=dilat)
        return cost, x_pad, weight, dilat  # extras returned only for checking


def _reference_conv(x_pad, weight, stride, dilation):
    return lax.conv_general_dilated(
        x_pad, weight,
        window_strides=(stride, stride),
        padding='VALID',
        rhs_dilation=(dilation, dilation),
        dimension_numbers=('NCHW', 'OIHW', 'NCHW'))


if __name__ == "__main__":
    angRes = 8
    Cin, Cout = 4, 8
    B, H, W = 2, 32, 32

    key = jax.random.PRNGKey(0)
    kx, kw = jax.random.split(key)
    x = jax.random.normal(kx, (B, Cin, H, W), dtype=jnp.float32)

    layer = CasualSubcostLayerPallas(Cin, Cout, angRes, kw)

    # Exercise all four conv branches / pad cases of the original forward().
    configs = [
        dict(interval=0.125,  index=2, mindisp=-0.25,  case=1),  # d == 0       -> DSAFE_0
        dict(interval=0.0625, index=4, mindisp=0.0,    case=3),  # index%4 == 0 -> DSAFE_0
        dict(interval=0.125,  index=2, mindisp=0.0,    case=2),  # index%4 == 2 -> DSAFE_1
        dict(interval=0.125,  index=1, mindisp=0.125,  case=4),  # index%4 == 1 -> DSAFE_2
    ]

    for cfg in configs:
        cost, x_pad, weight, dilat = layer(x, **cfg)
        cost = jax.block_until_ready(cost)
        ref = _reference_conv(x_pad, weight, angRes, dilat)
        assert cost.shape == ref.shape, (cost.shape, ref.shape)
        assert jnp.allclose(cost, ref, atol=1e-4, rtol=1e-4), (
            f"mismatch for cfg {cfg}")

    print("KERNEL_OK")
</pallas_src>

<mosaic_0001>
module attributes {stable_mosaic.version = 11 : i64} {
  func.func @_gemm_kernel(%arg0: i32, %arg1: memref<8x104xf32, #tpu.memory_space<vmem>>, %arg2: memref<104x128xf32, #tpu.memory_space<vmem>>, %arg3: memref<8x128xf32, #tpu.memory_space<vmem>>) attributes {dimension_semantics = [#tpu.dimension_semantics<parallel>], iteration_bounds = array<i64: 1>, scalar_prefetch = 0 : i64, scratch_operands = 0 : i64, tpu.core_type = #tpu.core_type<tc>, window_params = [{pipeline_mode = #tpu.pipeline_mode<synchronous>, transform_indices = @transform_0, window_bounds = array<i64: 8, 104>}, {transform_indices = @transform_1, window_bounds = array<i64: 104, 128>}, {transform_indices = @transform_2, window_bounds = array<i64: 8, 128>}]} {
    %c0 = arith.constant 0 : index
    %c0_0 = arith.constant 0 : index
    %0 = vector.load %arg1[%c0, %c0_0] : memref<8x104xf32, #tpu.memory_space<vmem>>, vector<8x104xf32>
    %c0_1 = arith.constant 0 : index
    %c0_2 = arith.constant 0 : index
    %1 = vector.load %arg2[%c0_1, %c0_2] : memref<104x128xf32, #tpu.memory_space<vmem>>, vector<104x128xf32>
    %cst = arith.constant dense<0.000000e+00> : vector<8x128xf32>
    %2 = tpu.matmul %0, %1, %cst {dimension_numbers = #tpu.dot_dimension_numbers<[1], [0], [0], [1], [0, 0, 1, 1], [], []>} : vector<8x104xf32>, vector<104x128xf32>, vector<8x128xf32> -> vector<8x128xf32>
    %c0_3 = arith.constant 0 : index
    %c0_4 = arith.constant 0 : index
    %3 = vector.load %arg3[%c0_3, %c0_4] : memref<8x128xf32, #tpu.memory_space<vmem>>, vector<8x128xf32>
    tpu.vector_store %arg3[%c0_3, %c0_4], %2 {strides = array<i32>} : memref<8x128xf32, #tpu.memory_space<vmem>>, vector<8x128xf32>,
    return
  }
  func.func @transform_0(%arg0: i32) -> (i32, i32) {
    %c0_i32 = arith.constant 0 : i32
    %c0_i32_0 = arith.constant 0 : i32
    %c0_i32_1 = arith.constant 0 : i32
    return %c0_i32, %c0_i32_0 : i32, i32
  }
  func.func @transform_1(%arg0: i32) -> (i32, i32) {
    %c0_i32 = arith.constant 0 : i32
    %c0_i32_0 = arith.constant 0 : i32
    return %c0_i32, %arg0 : i32, i32
  }
  func.func @transform_2(%arg0: i32) -> (i32, i32) {
    %c0_i32 = arith.constant 0 : i32
    %c0_i32_0 = arith.constant 0 : i32
    return %c0_i32, %arg0 : i32, i32
  }
}

</mosaic_0001>

<bundles_post_ra>
// kernel: tpu_custom_call.1
= control target key start
LH: loop header
LB: loop body
LE: loop exit
PB: predicated region body
PF: predicated region fallthrough
CT: control target
= control target key end

     0   :  { %7 = vsyncpa [#allocation3], 0  ;;  %s351_s0 = inlined_call_operand.hbm [shape: f32[8,104], index: 0, kind: input, shape index: {}]   ;;  %s352_s1 = inlined_call_operand.hbm [shape: f32[104,128], index: 1, kind: input, shape index: {}]   ;;  %s353_s2 = inlined_call_operand.hbm [shape: f32[8,128], index: 2, kind: output, shape index: {}]  }
   0x1   :  { %8 = vsyncpa [#allocation6], 0 }
   0x2   :  { %9 = vsyncpa [#allocation4], 0  ;;  %s285_s9 = smov [#allocation2]   ;;  %s286_s11 = smov [#allocation5]  }
   0x3   :  { %s16_s10 = sshll.u32 %s285_s9, 4  ;;  %s25_s12 = sshll.u32 %s286_s11, 4  ;;  %s17_s10 = int_to_ptr.vmem [resolvable:$true] %s16_s10  ;;  %s308_s12 = int_to_ptr.vmem [resolvable:$true] %s25_s12 }
   0x4   :  { %s213_s15 = scalar_lea.hbm %s351_s0, 128 }
   0x5   :  { %p214_p0 = scmp.ne.s32.totalorder %s351_s0, %s213_s15  ;;  %p217_p1 = scmp.lt.u32.totalorder %s213_s15, %s351_s0 }
   0x7   :  { %p219_p2 = pnand %p217_p1, %p214_p0 }
   0x9   :  { %222 = shalt.err (!%p219_p2)
}
   0xa   :  { %s223_s20 = scalar_lea.vmem %s17_s10, 128  ;;  %p228_p4 = scmp.lt.s32.totalorder %s17_s10, %s17_s10 }
   0xb   :  { %p224_p3 = scmp.ne.s32.totalorder %s17_s10, %s223_s20  ;;  %p229_p5 = scmp.lt.s32.totalorder %s223_s20, %s223_s20 }
   0xd   :  { %p230_p6 = por %p229_p5, %p228_p4 }
   0xf   :  { %p231_p7 = pnand %p230_p6, %p224_p3 }
  0x11   :  { %234 = shalt.err (!%p231_p7)
}
  0x12   :  { %19 = dma.hbm_to_vmem [thread:$0]  %s351_s0, 128, %s17_s10, [#allocation3]  }
  0x13   :  { %s235_s25 = scalar_lea.hbm %s352_s1, 1664 }
  0x14   :  { %p236_p8 = scmp.ne.s32.totalorder %s352_s1, %s235_s25  ;;  %p239_p9 = scmp.lt.u32.totalorder %s235_s25, %s352_s1 }
  0x16   :  { %p241_p10 = pnand %p239_p9, %p236_p8 }
  0x18   :  { %244 = shalt.err (!%p241_p10)
}
  0x19   :  { %s245_s30 = scalar_lea.vmem %s308_s12, 1664  ;;  %p250_p12 = scmp.lt.s32.totalorder %s308_s12, %s308_s12 }
  0x1a   :  { %p246_p11 = scmp.ne.s32.totalorder %s308_s12, %s245_s30  ;;  %p251_p13 = scmp.lt.s32.totalorder %s245_s30, %s245_s30 }
  0x1c   :  { %p252_p0 = por %p251_p13, %p250_p12 }
  0x1e   :  { %p253_p1 = pnand %p252_p0, %p246_p11 }
  0x20   :  { %256 = shalt.err (!%p253_p1)
}
  0x21   :  { %s287_s0 = smov 128   ;;  %s288_s3 = smov 8  }
  0x22   :  { %31 = dma.hbm_to_vmem [thread:$0]  %s352_s1, 1664, %s308_s12, [#allocation6], %s287_s0, %s287_s0, %s288_s3  }
  0x23   :  { %279 = dma.done.wait [#allocation3], 128  }
  0x24   :  { %280 = vsyncadd [#allocation3], 4294967168 }
  0x25   :  { %281 = dma.done.wait [#allocation6], 1664  }
  0x26   :  { %282 = vsyncadd [#allocation6], 4294965632  ;;  %v289_v0 = vmov 0.0|0.0   ;;  %vm290_vm0 = vmmov 0   ;;  %v291_v1 = vmov 0.0   ;;  %v39_v2 = vld [vmem:[#allocation5] sm:$0xff] }
  0x27   :  { %187 = vmatprep.subr.bf16.mxu0 %v289_v0  ;;  %184 = vmatprep.mubr.msk.f32.mxu0 %vm290_vm0, %v291_v1  ;;  %v40_v3 = vld [vmem:[#allocation5 + $0x8] sm:$0xff]  ;;  %v41_v4 = vld [vmem:[#allocation5 + $0x10] sm:$0xff]  ;;  %v42_v6 = vld [vmem:[#allocation5 + $0x18] sm:$0xff]  ;;  %vm52_vm1 = vcmask 850944   ;;  %s292_s1 = smov [#allocation7]  }
  0x28   :  { %v188_v5 = vpack.c.bf16 %v40_v3, %v39_v2  ;;  %v191_v7 = vpack.c.bf16 %v42_v6, %v41_v4  ;;  %v43_v8 = vld [vmem:[#allocation5 + $0x20] sm:$0xff]  ;;  %v44_v9 = vld [vmem:[#allocation5 + $0x28] sm:$0xff]  ;;  %v45_v11 = vld [vmem:[#allocation5 + $0x30] sm:$0xff]  ;;  %s133_s6 = sshll.u32 %s292_s1, 4  ;;  %s134_s6 = int_to_ptr.vmem [resolvable:$true] %s133_s6 }
  0x29   :  { %v194_v10 = vpack.c.bf16 %v44_v9, %v43_v8  ;;  %v46_v12 = vld [vmem:[#allocation5 + $0x38] sm:$0xff]  ;;  %v47_v14 = vld [vmem:[#allocation5 + $0x40] sm:$0xff]  ;;  %v48_v15 = vld [vmem:[#allocation5 + $0x48] sm:$0xff]  ;;  %s257_s7 = scalar_lea.vmem %s134_s6, 128  ;;  %p262_p3 = scmp.lt.s32.totalorder %s134_s6, %s134_s6 }
  0x2a   :  { %189 = vmatpush3.bf16.msra.mxu0 %v188_v5  ;;  %v197_v13 = vpack.c.bf16 %v46_v12, %v45_v11  ;;  %v200_v16 = vpack.c.bf16 %v48_v15, %v47_v14  ;;  %v49_v17 = vld [vmem:[#allocation5 + $0x50] sm:$0xff]  ;;  %v50_v18 = vld [vmem:[#allocation5 + $0x58] sm:$0xff]  ;;  %v51_v20 = vld [vmem:[#allocation5 + $0x60] sm:$0xff]  ;;  %p258_p2 = scmp.ne.s32.totalorder %s134_s6, %s257_s7  ;;  %p263_p4 = scmp.lt.s32.totalorder %s257_s7, %s257_s7 }
  0x2b   :  { %190 = vmatprep.subr.bf16.mxu0 %v289_v0  ;;  %v203_v19 = vpack.c.bf16 %v50_v18, %v49_v17  ;;  %v38_v21 = vld [vmem:[#allocation2] sm:$0xff] }
  0x2c   :  { %p264_p5 = por %p263_p4, %p262_p3 }
  0x2e   :  { %192 = vmatpush3.bf16.msra.mxu0 %v191_v7  ;;  %p265_p6 = pnand %p264_p5, %p258_p2 }
  0x2f   :  { %193 = vmatprep.subr.bf16.mxu0 %v289_v0 }
  0x32   :  { %195 = vmatpush3.bf16.msra.mxu0 %v194_v10 }
  0x33   :  { %196 = vmatprep.subr.bf16.mxu0 %v289_v0 }
  0x36   :  { %198 = vmatpush3.bf16.msra.mxu0 %v197_v13 }
  0x37   :  { %199 = vmatprep.subr.bf16.mxu0 %v289_v0 }
  0x3a   :  { %201 = vmatpush3.bf16.msra.mxu0 %v200_v16 }
  0x3b   :  { %202 = vmatprep.subr.bf16.mxu0 %v289_v0 }
  0x3e   :  { %204 = vmatpush3.bf16.msra.mxu0 %v203_v19 }
  0x3f   :  { %182 = vmatprep.subr.mxu0 %v291_v1 }
  0x42   :  { %183 = vmatpush3.msra.mxu0 %v51_v20 }
  0x43   :  { %185 = vmatmul.mubr.msk.f32.vlgmr.msra.gmra.mrb[0].mxu0 %vm52_vm1, %v38_v21 }
 0x116   :  { %v122_v22 = vpop.f32.mrb[0].mxu0 }
 0x117   :  { %126 = vst [vmem:[#allocation7] sm:$0xff] %v122_v22  ;;  %v186_v23 = vpop.f32.mrb[1].mxu0 }
 0x118   :  { %268 = shalt.err (!%p265_p6)
}
 0x119   :  { %s269_s10 = scalar_lea.hbm %s353_s2, 128 }
 0x11a   :  { %p270_p7 = scmp.ne.s32.totalorder %s353_s2, %s269_s10  ;;  %p273_p8 = scmp.lt.u32.totalorder %s269_s10, %s353_s2 }
 0x11c   :  { %p275_p9 = pnand %p273_p8, %p270_p7 }
 0x11e   :  { %278 = shalt.err (!%p275_p9)
}
 0x11f   :  { %136 = dma.vmem_to_hbm [thread:$0]  %s134_s6, 128, %s353_s2, [#allocation4]  }
 0x120   :  { %283 = dma.done.wait [#allocation4], 128  }
 0x121   :  { %284 = vsyncadd [#allocation4], 4294967168 }
 0x122   :  { %140 = vsyncpa [#allocation3], 1 }
 0x123   :  { %141 = vsyncpa [#allocation6], 1 }
 0x124   :  { %142 = vsyncpa [#allocation4], 1 }

</bundles_post_ra>
